<compile_context>
chip_gen: v7x
topology: tpu7x:2x2x1
jax: 0.10.0
libtpu: 0.0.40
codegen_flags: <defaults>
</compile_context>

<pallas_src>
import jax
import jax.numpy as jnp
from jax.experimental import pallas as pl
from jax.experimental.pallas import tpu as pltpu


def _round_up(x: int, n: int) -> int:
    return ((x + n - 1) // n) * n


# Stay well under the scoped-VMEM default on every generation (16 MiB v5e default is
# raised explicitly below; v7x physical VMEM is 64 MiB, so 32 MiB scoped is always safe).
_VMEM_BUDGET_BYTES = 24 * 1024 * 1024
_VMEM_LIMIT_BYTES = 32 * 1024 * 1024


def _choose_row_tile(m: int, d: int, c: int, out_bytes: int, block_m: int) -> int:
    """Pick the row (token) tile size.

    - multiple of 16 (bf16 packs two rows per sublane; avoids Mosaic relayouts)
    - double-buffered (f32 activation tile + both output tiles) fits the VMEM budget
    - for small M, prefer >= 2 row blocks so both v7x TensorCores get work
    """
    per_row = 2 * (d * 4 + 5 * c * out_bytes)          # double-buffered act + outputs
    weight_bytes = 2 * (d * 5 * c * 2)                 # bf16 weights (2 buffers, worst case)
    cap = max(16, ((_VMEM_BUDGET_BYTES - weight_bytes) // per_row) // 16 * 16)
    tm = min(block_m, cap)
    if m <= tm:
        if m >= 32:
            tm = _round_up(-(-m // 2), 16)             # >= 2 blocks, multiple of 16
        else:
            tm = m                                     # full extent: always a legal block
    return tm


def _decoder_kernel(h_ref, wl_ref, wb_ref, label_ref, bbox_ref):
    # Cast activations to the (bf16) weight dtype in VMEM — no extra HBM pass —
    # and do both projections with f32 MXU accumulation.
    a = h_ref[...].astype(wl_ref.dtype)
    label_ref[...] = jnp.dot(
        a, wl_ref[...], preferred_element_type=jnp.float32).astype(label_ref.dtype)
    bbox_ref[...] = jnp.dot(
        a, wb_ref[...], preferred_element_type=jnp.float32).astype(bbox_ref.dtype)


def prepare_layout_decoder_weights(w_label, w_bbox, compute_dtype=jnp.bfloat16):
    """One-time weight prep (model-init time, NOT the per-call hot path).

    w_label: (C, D)   nn.Linear weight layout (out_features x in_features)
    w_bbox : (4*C, D) rows ordered (class, coord) with coord fastest (matches the
                      'b s (c x) -> b s c x' rearrange of the PyTorch module)
    returns (w_label_t, w_bbox_t): pre-transposed (D, C) / (D, 4C) in compute_dtype.
    """
    c, d = w_label.shape
    assert w_bbox.shape == (4 * c, d)
    return (jnp.asarray(w_label.T, dtype=compute_dtype),
            jnp.asarray(w_bbox.T, dtype=compute_dtype))


def layout_decoder(h, w_label_t, w_bbox_t, *, block_m: int = 1024,
                   out_dtype=jnp.float32):
    """
    h         : (b, s, D) activations (any float dtype; cast to bf16 inside the kernel)
    w_label_t : (D, C)   from prepare_layout_decoder_weights
    w_bbox_t  : (D, 4*C) from prepare_layout_decoder_weights
    returns dict:
      'logit_label': (b, s, C)    out_dtype (float32 by default)
      'logit_bbox' : (b, s, C, 4) out_dtype
    """
    b, s, d = h.shape
    c = w_label_t.shape[1]
    assert w_label_t.shape == (d, c)
    assert w_bbox_t.shape == (d, 4 * c)

    m = b * s
    out_bytes = jnp.dtype(out_dtype).itemsize
    tm = _choose_row_tile(m, d, c, out_bytes, block_m)
    grid_m = pl.cdiv(m, tm)        # ragged last block handled by Pallas (no pad / slice)

    h2 = h.reshape(m, d)           # contiguous reshape: free, no HBM pass

    cost = pl.CostEstimate(
        flops=2 * m * d * 5 * c,
        bytes_accessed=m * d * h2.dtype.itemsize
        + d * 5 * c * w_label_t.dtype.itemsize
        + m * 5 * c * out_bytes,
        transcendentals=0,
    )

    label, bbox = pl.pallas_call(
        _decoder_kernel,
        out_shape=(jax.ShapeDtypeStruct((m, c), out_dtype),
                   jax.ShapeDtypeStruct((m, 4 * c), out_dtype)),
        grid_spec=pltpu.PrefetchScalarGridSpec(
            num_scalar_prefetch=0,
            grid=(grid_m,),
            in_specs=[
                # Activation tile streams over the row grid (f32 straight from HBM).
                pl.BlockSpec((tm, d), lambda i: (i, 0)),
                # Weights: constant block index -> DMA'd once, VMEM-resident.
                pl.BlockSpec((d, c), lambda i: (0, 0)),
                pl.BlockSpec((d, 4 * c), lambda i: (0, 0)),
            ],
            out_specs=[
                pl.BlockSpec((tm, c), lambda i: (i, 0)),
                pl.BlockSpec((tm, 4 * c), lambda i: (i, 0)),
            ],
        ),
        compiler_params=pltpu.CompilerParams(
            # Independent row tiles -> shard across TensorCores (v7x megacore).
            dimension_semantics=("parallel",),
            vmem_limit_bytes=_VMEM_LIMIT_BYTES,
        ),
        cost_estimate=cost,
    )(h2, w_label_t, w_bbox_t)

    return {
        "logit_label": label.reshape(b, s, c),
        # rearrange 'b s (c x) -> b s c x', x=4: contiguous reshape (coord fastest).
        "logit_bbox": bbox.reshape(b, s, c, 4),
    }


def _reference(h, w_label, w_bbox, compute_dtype=jnp.bfloat16):
    # Matches the kernel's compute precision: bf16 operands, f32 accumulation.
    b, s, d = h.shape
    c = w_label.shape[0]
    hc = h.astype(compute_dtype)
    label = jnp.einsum(
        "bsd,cd->bsc", hc, w_label.astype(compute_dtype),
        preferred_element_type=jnp.float32)
    bbox = jnp.einsum(
        "bsd,kd->bsk", hc, w_bbox.astype(compute_dtype),
        preferred_element_type=jnp.float32).reshape(b, s, c, 4)
    return {"logit_label": label, "logit_bbox": bbox}


if __name__ == "__main__":
    # Small shapes consistent with the module: batch=2, seq=8, input_dim=32, num_classes=16
    b, s, input_dim, num_classes = 2, 8, 32, 16

    key = jax.random.PRNGKey(0)
    k_h, k_wl, k_wb = jax.random.split(key, 3)

    h = jax.random.normal(k_h, (b, s, input_dim), dtype=jnp.float32)
    # nn.Linear(bias=False) weight layout: (out_features, in_features)
    w_label = jax.random.normal(k_wl, (num_classes, input_dim), dtype=jnp.float32) * 0.05
    w_bbox = jax.random.normal(k_wb, (4 * num_classes, input_dim), dtype=jnp.float32) * 0.05

    # One-time weight prep (transpose + bf16 cast), outside the per-call hot path.
    w_label_t, w_bbox_t = prepare_layout_decoder_weights(w_label, w_bbox)

    decoder = jax.jit(layout_decoder)
    out = decoder(h, w_label_t, w_bbox_t)
    jax.block_until_ready(out)

    ref = _reference(h, w_label, w_bbox)
    assert out["logit_label"].shape == (b, s, num_classes)
    assert out["logit_bbox"].shape == (b, s, num_classes, 4)
    assert out["logit_label"].dtype == jnp.float32
    assert out["logit_bbox"].dtype == jnp.float32
    assert jnp.allclose(out["logit_label"], ref["logit_label"], atol=1e-2, rtol=1e-2)
    assert jnp.allclose(out["logit_bbox"], ref["logit_bbox"], atol=1e-2, rtol=1e-2)

    print("KERNEL_OK")
</pallas_src>

<mosaic_0001>
module attributes {stable_mosaic.version = 11 : i64} {
  func.func @_decoder_kernel(%arg0: i32, %arg1: memref<16x32xf32, #tpu.memory_space<vmem>>, %arg2: memref<32x16xbf16, #tpu.memory_space<vmem>>, %arg3: memref<32x64xbf16, #tpu.memory_space<vmem>>, %arg4: memref<16x16xf32, #tpu.memory_space<vmem>>, %arg5: memref<16x64xf32, #tpu.memory_space<vmem>>) attributes {dimension_semantics = [#tpu.dimension_semantics<parallel>], iteration_bounds = array<i64: 1>, scalar_prefetch = 0 : i64, scratch_operands = 0 : i64, tpu.core_type = #tpu.core_type<tc>, window_params = [{transform_indices = @transform_0, window_bounds = array<i64: 16, 32>}, {pipeline_mode = #tpu.pipeline_mode<synchronous>, transform_indices = @transform_1, window_bounds = array<i64: 32, 16>}, {pipeline_mode = #tpu.pipeline_mode<synchronous>, transform_indices = @transform_2, window_bounds = array<i64: 32, 64>}, {transform_indices = @transform_3, window_bounds = array<i64: 16, 16>}, {transform_indices = @transform_4, window_bounds = array<i64: 16, 64>}]} {
    %c0 = arith.constant 0 : index
    %c0_0 = arith.constant 0 : index
    %0 = vector.load %arg1[%c0, %c0_0] : memref<16x32xf32, #tpu.memory_space<vmem>>, vector<16x32xf32>
    %1 = arith.truncf %0 : vector<16x32xf32> to vector<16x32xbf16>
    %c0_1 = arith.constant 0 : index
    %c0_2 = arith.constant 0 : index
    %2 = vector.load %arg2[%c0_1, %c0_2] : memref<32x16xbf16, #tpu.memory_space<vmem>>, vector<32x16xbf16>
    %cst = arith.constant dense<0.000000e+00> : vector<16x16xf32>
    %3 = tpu.matmul %1, %2, %cst {dimension_numbers = #tpu.dot_dimension_numbers<[1], [0], [0], [1], [0, 0, 1, 1], [], []>} : vector<16x32xbf16>, vector<32x16xbf16>, vector<16x16xf32> -> vector<16x16xf32>
    %c0_3 = arith.constant 0 : index
    %c0_4 = arith.constant 0 : index
    %4 = vector.load %arg4[%c0_3, %c0_4] : memref<16x16xf32, #tpu.memory_space<vmem>>, vector<16x16xf32>
    tpu.vector_store %arg4[%c0_3, %c0_4], %3 {strides = array<i32>} : memref<16x16xf32, #tpu.memory_space<vmem>>, vector<16x16xf32>,
    %c0_5 = arith.constant 0 : index
    %c0_6 = arith.constant 0 : index
    %5 = vector.load %arg3[%c0_5, %c0_6] : memref<32x64xbf16, #tpu.memory_space<vmem>>, vector<32x64xbf16>
    %cst_7 = arith.constant dense<0.000000e+00> : vector<16x64xf32>
    %6 = tpu.matmul %1, %5, %cst_7 {dimension_numbers = #tpu.dot_dimension_numbers<[1], [0], [0], [1], [0, 0, 1, 1], [], []>} : vector<16x32xbf16>, vector<32x64xbf16>, vector<16x64xf32> -> vector<16x64xf32>
    %c0_8 = arith.constant 0 : index
    %c0_9 = arith.constant 0 : index
    %7 = vector.load %arg5[%c0_8, %c0_9] : memref<16x64xf32, #tpu.memory_space<vmem>>, vector<16x64xf32>
    tpu.vector_store %arg5[%c0_8, %c0_9], %6 {strides = array<i32>} : memref<16x64xf32, #tpu.memory_space<vmem>>, vector<16x64xf32>,
    return
  }
  func.func @transform_0(%arg0: i32) -> (i32, i32) {
    %c0_i32 = arith.constant 0 : i32
    %c0_i32_0 = arith.constant 0 : i32
    return %arg0, %c0_i32 : i32, i32
  }
  func.func @transform_1(%arg0: i32) -> (i32, i32) {
    %c0_i32 = arith.constant 0 : i32
    %c0_i32_0 = arith.constant 0 : i32
    %c0_i32_1 = arith.constant 0 : i32
    return %c0_i32, %c0_i32_0 : i32, i32
  }
  func.func @transform_2(%arg0: i32) -> (i32, i32) {
    %c0_i32 = arith.constant 0 : i32
    %c0_i32_0 = arith.constant 0 : i32
    %c0_i32_1 = arith.constant 0 : i32
    return %c0_i32, %c0_i32_0 : i32, i32
  }
  func.func @transform_3(%arg0: i32) -> (i32, i32) {
    %c0_i32 = arith.constant 0 : i32
    %c0_i32_0 = arith.constant 0 : i32
    return %arg0, %c0_i32 : i32, i32
  }
  func.func @transform_4(%arg0: i32) -> (i32, i32) {
    %c0_i32 = arith.constant 0 : i32
    %c0_i32_0 = arith.constant 0 : i32
    return %arg0, %c0_i32 : i32, i32
  }
}

</mosaic_0001>

<bundles_post_ra>
// kernel: layout_decoder.1
= control target key start
LH: loop header
LB: loop body
LE: loop exit
PB: predicated region body
PF: predicated region fallthrough
CT: control target
= control target key end

     0   :  { %v226_v1 = vmov 0.0   ;;  %vm227_vm0 = vmmov 0   ;;  %s299_s0 = inlined_call_operand.vmem [shape: f32[16,32], index: 0, kind: input, shape index: {}]   ;;  %s300_s1 = inlined_call_operand.vmem [shape: bf16[32,16], index: 1, kind: input, shape index: {}]   ;;  %s301_s2 = inlined_call_operand.vmem [shape: bf16[32,64], index: 2, kind: input, shape index: {}]   ;;  %s302_s3 = inlined_call_operand.hbm [shape: f32[16,16], index: 3, kind: output, shape index: {0}]   ;;  %s303_s4 = inlined_call_operand.vmem [shape: f32[16,64], index: 4, kind: output, shape index: {1}]  }
   0x1   :  { %v198_v0 = vld [vmem:[%s300_s1] sm:$0xff]   ;;  %177 = vmatprep.subr.bf16.mxu0 %v226_v1  ;;  %185 = vmatprep.subr.bf16.mxu1 %v226_v1  ;;  %v200_v3 = vld [vmem:[%s300_s1 + $0x8] sm:$0xff]  }
   0x2   :  { %v199_v2 = vld [vmem:[%s301_s2] sm:$0xff]   ;;  %178 = vmatpush3.bf16.msra.mxu0 %v198_v0  ;;  %181 = vmatprep.mubr.msk.bf16.mxu0 %vm227_vm0, %v226_v1  ;;  %v201_v4 = vld [vmem:[%s301_s2 + $0x8] sm:$0xff]  }
   0x3   :  { %186 = vmatpush3.bf16.msra.mxu1 %v199_v2  ;;  %179 = vmatprep.subr.bf16.mxu0 %v226_v1  ;;  %v18_v5 = vld [vmem:[%s299_s0] sm:$0xff]  ;;  %v19_v6 = vld [vmem:[%s299_s0 + $0x8] sm:$0xff] }
   0x4   :  { %187 = vmatprep.subr.bf16.mxu1 %v226_v1  ;;  %189 = vmatprep.mubr.msk.bf16.mxu1 %vm227_vm0, %v226_v1 }
   0x5   :  { %10 = vsyncpa [#allocation3], 0  ;;  %v20_v7 = vpack.c.bf16 %v19_v6, %v18_v5  ;;  %vm37_vm1 = vcmask 261120   ;;  %s228_s1 = smov [#allocation2]   ;;  %vm82_vm2 = vcmask 130048   ;;  %vm142_vm3 = vcmask 523264  }
   0x6   :  { %180 = vmatpush3.bf16.msra.mxu0 %v200_v3  ;;  %s150_s27 = sshll.u32 %s228_s1, 4  ;;  %s274_s27 = int_to_ptr.vmem [resolvable:$true] %s150_s27 }
   0x7   :  { %188 = vmatpush3.bf16.msra.mxu1 %v201_v4  ;;  %s202_s30 = scalar_lea.vmem %s274_s27, 256  ;;  %p207_p1 = scmp.lt.s32.totalorder %s274_s27, %s274_s27 }
   0x8   :  { %p203_p0 = scmp.ne.s32.totalorder %s274_s27, %s202_s30  ;;  %p208_p2 = scmp.lt.s32.totalorder %s202_s30, %s202_s30 }
   0x9   :  { %182 = vmatmul.mubr.msk.bf16.vlgmr.msra.gmra.mrb[0].mxu0 %vm37_vm1, %v20_v7 }
   0xa   :  { %190 = vmatmul.mubr.msk.bf16.vlgmr.msra.gmra.mrb[0].mxu1 %vm37_vm1, %v20_v7  ;;  %p209_p3 = por %p208_p2, %p207_p1 }
   0xc   :  { %p210_p4 = pnand %p209_p3, %p203_p0 }
  0xdc   :  { %v75_v8 = vpop.f32.mrb[0].mxu0 }
  0xdd   :  { %83 = vst.msk [vmem:[#allocation2] sm:$0xff] %vm82_vm2, %v75_v8  ;;  %v135_v9 = vpop.f32.mrb[0].mxu1  ;;  %v183_v10 = vpop.f32.mrb[1].mxu0 }
  0xde   :  { %143 = vst.msk [vmem:[%s303_s4] sm:$0xff] %vm142_vm3, %v135_v9  ;;  %v191_v11 = vpop.f32.mrb[1].mxu1  ;;  %v78_v12 = vpop.f32.mrb[2].mxu0 }
  0xdf   :  { %84 = vst.msk [vmem:[#allocation2 + $0x8] sm:$0xff] %vm82_vm2, %v78_v12  ;;  %v138_v13 = vpop.f32.mrb[2].mxu1  ;;  %v184_v14 = vpop.f32.mrb[3].mxu0 }
  0xe0   :  { %144 = vst.msk [vmem:[%s303_s4 + $0x8] sm:$0xff] %vm142_vm3, %v138_v13  ;;  %v192_v15 = vpop.f32.mrb[3].mxu1 }
  0xe1   :  { %213 = shalt.err (!%p210_p4)
}
  0xe2   :  { %s214_s7 = scalar_lea.hbm %s302_s3, 256 }
  0xe3   :  { %p215_p5 = scmp.ne.s32.totalorder %s302_s3, %s214_s7  ;;  %p218_p6 = scmp.lt.u32.totalorder %s214_s7, %s302_s3 }
  0xe5   :  { %p220_p7 = pnand %p218_p6, %p215_p5 }
  0xe7   :  { %223 = shalt.err (!%p220_p7)
}
  0xe8   :  { %s229_s4 = smov 128   ;;  %s230_s12 = smov 8  }
  0xe9   :  { %156 = dma.vmem_to_hbm [thread:$0]  %s274_s27, 256, %s302_s3, [#allocation3], %s229_s4, %s229_s4, %s230_s12  }
  0xea   :  { %224 = dma.done.wait [#allocation3], 256  }
  0xeb   :  { %225 = vsyncadd [#allocation3], 4294967040 }
  0xec   :  { %164 = vsyncpa [#allocation3], 1 }

</bundles_post_ra>
